<compile_context>
chip_gen: v7x
topology: tpu7x:2x2x1
jax: 0.10.0
libtpu: 0.0.40
codegen_flags: <defaults>
</compile_context>

<pallas_src>
import numpy as np
import jax
import jax.numpy as jnp
from jax.experimental import pallas as pl
from jax.experimental.pallas import tpu as pltpu


# ----------------------------------------------------------------------------
# Noise scheduler (linear betas), deterministic, in-script.
# ----------------------------------------------------------------------------
def make_alphas_cumprod(num_steps=100, beta_start=1e-4, beta_end=0.02):
    betas = jnp.linspace(beta_start, beta_end, num_steps, dtype=jnp.float32)
    return jnp.cumprod(1.0 - betas)


# ----------------------------------------------------------------------------
# Fused kernel: forward_noise + channel concat + adaLN-MLP ray predictor.
# Channel-major layout: every block is (C, tHW) with H*W on the lane axis.
#   rays_noisy = rays + mask * (sqrt(ab)*rays + sqrt(1-ab)*eps - rays)
#   h = W1f^T @ feat + W1r^T @ rays_noisy + W1n^T @ ndc + b1        (Hd, tHW)
#   h = h * (1 + scale_t) + shift_t ; h = gelu(h)
#   y = W2^T @ h + b2                                               (Cout, tHW)
# ----------------------------------------------------------------------------
def _ray_diffuser_kernel(sab_ref, s1mab_ref,
                         feat_ref, rays_ref, eps_ref, mask_ref, ndc_ref,
                         w1f_ref, w1r_ref, w1n_ref, b1_ref,
                         scale_ref, shift_ref, w2_ref, b2_ref,
                         o_ref):
    b = pl.program_id(0)
    sab = sab_ref[b]            # scalar sqrt(alpha_bar) for this batch element
    s1mab = s1mab_ref[b]        # scalar sqrt(1 - alpha_bar)

    feat = feat_ref[0, 0]       # (F,  tHW) f32
    rays = rays_ref[0, 0]       # (Rd, tHW)
    eps = eps_ref[0, 0]         # (Rd, tHW)
    m = mask_ref[0, 0]          # (Rd, tHW)
    ndc = ndc_ref[0, 0]         # (Nd, tHW)

    # forward diffusion + masked blend (x + m*(x_noise - x): one fewer mul).
    x_noise = sab * rays + s1mab * eps
    rays_noisy = rays + m * (x_noise - rays)

    # fused "concat + input projection": three accumulated bf16 MXU dots,
    # f32 accumulation.
    h = jnp.dot(w1f_ref[...], feat.astype(jnp.bfloat16),
                preferred_element_type=jnp.float32)
    h = h + jnp.dot(w1r_ref[...], rays_noisy.astype(jnp.bfloat16),
                    preferred_element_type=jnp.float32)
    h = h + jnp.dot(w1n_ref[...], ndc.astype(jnp.bfloat16),
                    preferred_element_type=jnp.float32)
    h = h + b1_ref[...]                                  # (Hd, 1) lane-broadcast

    # adaLN timestep modulation + GELU, kept in f32 (v5e-safe epilogue).
    h = h * (1.0 + scale_ref[0]) + shift_ref[0]
    # TODO(synk): PyTorch nn.GELU defaults to exact erf; tanh approximation used
    # here (matches the DiT reference MLP and lowers cleanly on Mosaic).
    h = jax.nn.gelu(h)

    y = jnp.dot(w2_ref[...], h.astype(jnp.bfloat16),
                preferred_element_type=jnp.float32)
    o_ref[0, 0] = (y + b2_ref[...]).astype(o_ref.dtype)  # lane-dense (Cout, tHW) store


# ----------------------------------------------------------------------------
# Glue: RayDiffuser.forward around the fused Pallas kernel.
# ----------------------------------------------------------------------------
def _pick_token_tile(hw, max_tile=2048):
    """Largest multiple of 128 that divides hw (falls back to hw)."""
    if hw % 128 != 0:
        return hw
    t = min(hw, max_tile)
    t -= t % 128
    while hw % t != 0:
        t -= 128
    return t


def timestep_embedding(t, dim):
    half = dim // 2
    freqs = jnp.exp(-np.log(10000.0) * jnp.arange(half, dtype=jnp.float32) / half)
    args = t.astype(jnp.float32)[:, None] * freqs[None, :]
    return jnp.concatenate([jnp.cos(args), jnp.sin(args)], axis=-1)  # (B, dim)


def ray_diffuser_forward(features, rays, ndc_coordinates, t, epsilon, mask,
                         params, alphas_cumprod):
    """
    features:        (B, N, F, H, W)
    rays:            (B, N, 6, H, W)
    ndc_coordinates: (B, N, 2, H, W)
    t:               (B,) int32
    epsilon:         (B, N, 6, H, W)   pre-drawn noise (deterministic)
    mask:            (B, N, 6, H, W)
    Returns (epsilon_pred (B, N, ray_dim, H, W), epsilon).
    """
    B, N, F, H, W = features.shape
    Rd = rays.shape[2]
    Nd = ndc_coordinates.shape[2]
    HW = H * W
    Hd = params["w1"].shape[1]
    Cout = params["w2"].shape[1]
    t = t.reshape(B)

    # per-batch diffusion scalars -> SMEM (no padded (B,1) VMEM tiles).
    alpha_bar = alphas_cumprod[t]
    sab = jnp.sqrt(alpha_bar).astype(jnp.float32)
    s1mab = jnp.sqrt(1.0 - alpha_bar).astype(jnp.float32)

    # channel-major slabs; free reshapes (H, W already innermost).
    feat_r = features.reshape(B, N, F, HW)
    rays_r = rays.reshape(B, N, Rd, HW)
    eps_r = epsilon.reshape(B, N, Rd, HW)
    mask_r = mask.reshape(B, N, Rd, HW)
    ndc_r = ndc_coordinates.reshape(B, N, Nd, HW)

    # timestep conditioning -> adaLN (scale, shift); tiny glue compute.
    temb = timestep_embedding(t, Hd)
    mod = temb @ params["w_t"] + params["b_t"]            # (B, 2*Hd)
    shift, scale = jnp.split(mod, 2, axis=-1)
    scale_c = scale.reshape(B, Hd, 1).astype(jnp.float32)
    shift_c = shift.reshape(B, Hd, 1).astype(jnp.float32)

    # weight prep (tiny, one-time): split W1 by the [features | rays | ndc]
    # concat order, transpose to channel-major, cast MXU operands to bf16.
    w1 = params["w1"]
    w1f_t = w1[:F].T.astype(jnp.bfloat16)                 # (Hd, F)
    w1r_t = w1[F:F + Rd].T.astype(jnp.bfloat16)           # (Hd, Rd)
    w1n_t = w1[F + Rd:].T.astype(jnp.bfloat16)            # (Hd, Nd)
    w2_t = params["w2"].T.astype(jnp.bfloat16)            # (Cout, Hd)
    b1_c = params["b1"].reshape(Hd, 1).astype(jnp.float32)
    b2_c = params["b2"].reshape(Cout, 1).astype(jnp.float32)

    tHW = _pick_token_tile(HW)
    nT = HW // tHW

    out = pl.pallas_call(
        _ray_diffuser_kernel,
        out_shape=jax.ShapeDtypeStruct((B, N, Cout, HW), jnp.float32),
        grid=(B, N, nT),
        in_specs=[
            pl.BlockSpec(memory_space=pltpu.MemorySpace.SMEM),            # sqrt(ab)
            pl.BlockSpec(memory_space=pltpu.MemorySpace.SMEM),            # sqrt(1-ab)
            pl.BlockSpec((1, 1, F, tHW), lambda b, n, i: (b, n, 0, i)),   # features
            pl.BlockSpec((1, 1, Rd, tHW), lambda b, n, i: (b, n, 0, i)),  # rays
            pl.BlockSpec((1, 1, Rd, tHW), lambda b, n, i: (b, n, 0, i)),  # epsilon
            pl.BlockSpec((1, 1, Rd, tHW), lambda b, n, i: (b, n, 0, i)),  # mask
            pl.BlockSpec((1, 1, Nd, tHW), lambda b, n, i: (b, n, 0, i)),  # ndc
            pl.BlockSpec((Hd, F), lambda b, n, i: (0, 0)),                # W1_feat^T
            pl.BlockSpec((Hd, Rd), lambda b, n, i: (0, 0)),               # W1_ray^T
            pl.BlockSpec((Hd, Nd), lambda b, n, i: (0, 0)),               # W1_ndc^T
            pl.BlockSpec((Hd, 1), lambda b, n, i: (0, 0)),                # b1
            pl.BlockSpec((1, Hd, 1), lambda b, n, i: (b, 0, 0)),          # scale_t
            pl.BlockSpec((1, Hd, 1), lambda b, n, i: (b, 0, 0)),          # shift_t
            pl.BlockSpec((Cout, Hd), lambda b, n, i: (0, 0)),             # W2^T
            pl.BlockSpec((Cout, 1), lambda b, n, i: (0, 0)),              # b2
        ],
        out_specs=pl.BlockSpec((1, 1, Cout, tHW), lambda b, n, i: (b, n, 0, i)),
        compiler_params=pltpu.CompilerParams(
            dimension_semantics=("parallel", "parallel", "parallel")),
    )(sab, s1mab, feat_r, rays_r, eps_r, mask_r, ndc_r,
      w1f_t, w1r_t, w1n_t, b1_c, scale_c, shift_c, w2_t, b2_c)

    epsilon_pred = out.reshape(B, N, Cout, H, W)
    return epsilon_pred, epsilon


# ----------------------------------------------------------------------------
# Deterministic parameter init + example run / self-check.
# ----------------------------------------------------------------------------
def init_params(key, in_dim, hidden, ray_dim):
    ks = jax.random.split(key, 4)
    return {
        "w1": 0.02 * jax.random.normal(ks[0], (in_dim, hidden), jnp.float32),
        "b1": jnp.zeros((hidden,), jnp.float32),
        "w2": 0.02 * jax.random.normal(ks[1], (hidden, ray_dim), jnp.float32),
        "b2": jnp.zeros((ray_dim,), jnp.float32),
        "w_t": 0.02 * jax.random.normal(ks[2], (hidden, 2 * hidden), jnp.float32),
        "b_t": jnp.zeros((2 * hidden,), jnp.float32),
    }


if __name__ == "__main__":
    # Small shapes consistent with the module: width=16 -> H=W=16,
    # max_num_images=1 -> N=1, ray_dim=6, append_ndc -> +2 channels,
    # synthetic feature_dim=8, hidden=32.
    B, N, H, W = 2, 1, 16, 16
    feat_dim, ray_dim, ndc_dim, hidden = 8, 6, 2, 32
    in_dim = feat_dim + ray_dim + ndc_dim  # 16

    key = jax.random.PRNGKey(0)
    k_feat, k_rays, k_ndc, k_eps, k_mask, k_par = jax.random.split(key, 6)

    features = jax.random.normal(k_feat, (B, N, feat_dim, H, W), jnp.float32)
    rays = jax.random.normal(k_rays, (B, N, ray_dim, H, W), jnp.float32)
    ndc = jax.random.normal(k_ndc, (B, N, ndc_dim, H, W), jnp.float32)
    epsilon = jax.random.normal(k_eps, (B, N, ray_dim, H, W), jnp.float32)
    # non-trivial 0/1 mask so the masked-blend path is actually exercised
    mask = (jax.random.uniform(k_mask, (B, N, ray_dim, H, W)) > 0.3).astype(jnp.float32)
    t = jnp.array([3, 7], dtype=jnp.int32)

    params = init_params(k_par, in_dim, hidden, ray_dim)
    alphas_cumprod = make_alphas_cumprod(100)

    fwd = jax.jit(ray_diffuser_forward)
    epsilon_pred, eps_out = fwd(features, rays, ndc, t, epsilon, mask,
                                params, alphas_cumprod)
    epsilon_pred = jax.block_until_ready(epsilon_pred)

    # Pure-JAX reference of the same math (bf16 MXU operands, f32 accumulation,
    # tanh-approx GELU) following the PyTorch forward structure.
    ab = alphas_cumprod[t].reshape(B, 1, 1, 1, 1)
    rn_ref = jnp.sqrt(ab) * rays + jnp.sqrt(1.0 - ab) * epsilon
    rn_ref = rn_ref * mask + rays * (1.0 - mask)
    scene_ref = jnp.concatenate([features, rn_ref, ndc], axis=2)
    tok_ref = jnp.transpose(scene_ref, (0, 1, 3, 4, 2)).reshape(B, N * H * W, in_dim)
    temb = timestep_embedding(t, hidden)
    shift_r, scale_r = jnp.split(temb @ params["w_t"] + params["b_t"], 2, axis=-1)
    h_ref = jnp.einsum("btc,ch->bth",
                       tok_ref.astype(jnp.bfloat16),
                       params["w1"].astype(jnp.bfloat16),
                       preferred_element_type=jnp.float32) + params["b1"]
    h_ref = h_ref * (1.0 + scale_r[:, None, :]) + shift_r[:, None, :]
    h_ref = jax.nn.gelu(h_ref)
    y_ref = jnp.einsum("bth,hc->btc",
                       h_ref.astype(jnp.bfloat16),
                       params["w2"].astype(jnp.bfloat16),
                       preferred_element_type=jnp.float32) + params["b2"]
    ep_ref = jnp.transpose(y_ref.reshape(B, N, H, W, ray_dim), (0, 1, 4, 2, 3))

    assert epsilon_pred.shape == (B, N, ray_dim, H, W)
    np.testing.assert_allclose(np.asarray(epsilon_pred), np.asarray(ep_ref),
                               rtol=1e-3, atol=1e-4)
    print("KERNEL_OK")
</pallas_src>

<mosaic_0001>
module attributes {stable_mosaic.version = 11 : i64} {
  func.func @_ray_diffuser_kernel(%arg0: i32, %arg1: i32, %arg2: i32, %arg3: memref<2xf32, #tpu.memory_space<smem>>, %arg4: memref<2xf32, #tpu.memory_space<smem>>, %arg5: memref<1x1x8x256xf32, #tpu.memory_space<vmem>>, %arg6: memref<1x1x6x256xf32, #tpu.memory_space<vmem>>, %arg7: memref<1x1x6x256xf32, #tpu.memory_space<vmem>>, %arg8: memref<1x1x6x256xf32, #tpu.memory_space<vmem>>, %arg9: memref<1x1x2x256xf32, #tpu.memory_space<vmem>>, %arg10: memref<32x8xbf16, #tpu.memory_space<vmem>>, %arg11: memref<32x6xbf16, #tpu.memory_space<vmem>>, %arg12: memref<32x2xbf16, #tpu.memory_space<vmem>>, %arg13: memref<32x1xf32, #tpu.memory_space<vmem>>, %arg14: memref<1x32x1xf32, #tpu.memory_space<vmem>>, %arg15: memref<1x32x1xf32, #tpu.memory_space<vmem>>, %arg16: memref<6x32xbf16, #tpu.memory_space<vmem>>, %arg17: memref<6x1xf32, #tpu.memory_space<vmem>>, %arg18: memref<1x1x6x256xf32, #tpu.memory_space<vmem>>) attributes {dimension_semantics = [#tpu.dimension_semantics<parallel>, #tpu.dimension_semantics<parallel>, #tpu.dimension_semantics<parallel>], iteration_bounds = array<i64: 2, 1, 1>, scalar_prefetch = 0 : i64, scratch_operands = 0 : i64, tpu.core_type = #tpu.core_type<tc>, window_params = [{transform_indices = @transform_0, window_bounds = array<i64: 2>}, {transform_indices = @transform_1, window_bounds = array<i64: 2>}, {transform_indices = @transform_2, window_bounds = array<i64: 1, 1, 8, 256>}, {transform_indices = @transform_3, window_bounds = array<i64: 1, 1, 6, 256>}, {transform_indices = @transform_4, window_bounds = array<i64: 1, 1, 6, 256>}, {transform_indices = @transform_5, window_bounds = array<i64: 1, 1, 6, 256>}, {transform_indices = @transform_6, window_bounds = array<i64: 1, 1, 2, 256>}, {pipeline_mode = #tpu.pipeline_mode<synchronous>, transform_indices = @transform_7, window_bounds = array<i64: 32, 8>}, {pipeline_mode = #tpu.pipeline_mode<synchronous>, transform_indices = @transform_8, window_bounds = array<i64: 32, 6>}, {pipeline_mode = #tpu.pipeline_mode<synchronous>, transform_indices = @transform_9, window_bounds = array<i64: 32, 2>}, {pipeline_mode = #tpu.pipeline_mode<synchronous>, transform_indices = @transform_10, window_bounds = array<i64: 32, 1>}, {transform_indices = @transform_11, window_bounds = array<i64: 1, 32, 1>}, {transform_indices = @transform_12, window_bounds = array<i64: 1, 32, 1>}, {pipeline_mode = #tpu.pipeline_mode<synchronous>, transform_indices = @transform_13, window_bounds = array<i64: 6, 32>}, {pipeline_mode = #tpu.pipeline_mode<synchronous>, transform_indices = @transform_14, window_bounds = array<i64: 6, 1>}, {transform_indices = @transform_15, window_bounds = array<i64: 1, 1, 6, 256>}]} {
    %0 = arith.index_cast %arg0 : i32 to index
    %1 = memref.load %arg3[%0] : memref<2xf32, #tpu.memory_space<smem>>
    %2 = arith.index_cast %arg0 : i32 to index
    %3 = memref.load %arg4[%2] : memref<2xf32, #tpu.memory_space<smem>>
    %c0 = arith.constant 0 : index
    %c0_0 = arith.constant 0 : index
    %c0_1 = arith.constant 0 : index
    %c0_2 = arith.constant 0 : index
    %4 = vector.load %arg5[%c0, %c0_0, %c0_1, %c0_2] : memref<1x1x8x256xf32, #tpu.memory_space<vmem>>, vector<1x1x8x256xf32>
    %5 = vector.shape_cast %4 : vector<1x1x8x256xf32> to vector<8x256xf32>
    %c0_3 = arith.constant 0 : index
    %c0_4 = arith.constant 0 : index
    %c0_5 = arith.constant 0 : index
    %c0_6 = arith.constant 0 : index
    %6 = vector.load %arg6[%c0_3, %c0_4, %c0_5, %c0_6] : memref<1x1x6x256xf32, #tpu.memory_space<vmem>>, vector<1x1x6x256xf32>
    %7 = vector.shape_cast %6 : vector<1x1x6x256xf32> to vector<6x256xf32>
    %c0_7 = arith.constant 0 : index
    %c0_8 = arith.constant 0 : index
    %c0_9 = arith.constant 0 : index
    %c0_10 = arith.constant 0 : index
    %8 = vector.load %arg7[%c0_7, %c0_8, %c0_9, %c0_10] : memref<1x1x6x256xf32, #tpu.memory_space<vmem>>, vector<1x1x6x256xf32>
    %9 = vector.shape_cast %8 : vector<1x1x6x256xf32> to vector<6x256xf32>
    %c0_11 = arith.constant 0 : index
    %c0_12 = arith.constant 0 : index
    %c0_13 = arith.constant 0 : index
    %c0_14 = arith.constant 0 : index
    %10 = vector.load %arg8[%c0_11, %c0_12, %c0_13, %c0_14] : memref<1x1x6x256xf32, #tpu.memory_space<vmem>>, vector<1x1x6x256xf32>
    %11 = vector.shape_cast %10 : vector<1x1x6x256xf32> to vector<6x256xf32>
    %c0_15 = arith.constant 0 : index
    %c0_16 = arith.constant 0 : index
    %c0_17 = arith.constant 0 : index
    %c0_18 = arith.constant 0 : index
    %12 = vector.load %arg9[%c0_15, %c0_16, %c0_17, %c0_18] : memref<1x1x2x256xf32, #tpu.memory_space<vmem>>, vector<1x1x2x256xf32>
    %13 = vector.shape_cast %12 : vector<1x1x2x256xf32> to vector<2x256xf32>
    %14 = vector.broadcast %1 : f32 to vector<6x256xf32>
    %15 = arith.mulf %14, %7 : vector<6x256xf32>
    %16 = vector.broadcast %3 : f32 to vector<6x256xf32>
    %17 = arith.mulf %16, %9 : vector<6x256xf32>
    %18 = arith.addf %15, %17 : vector<6x256xf32>
    %19 = arith.subf %18, %7 : vector<6x256xf32>
    %20 = arith.mulf %11, %19 : vector<6x256xf32>
    %21 = arith.addf %7, %20 : vector<6x256xf32>
    %c0_19 = arith.constant 0 : index
    %c0_20 = arith.constant 0 : index
    %22 = vector.load %arg10[%c0_19, %c0_20] : memref<32x8xbf16, #tpu.memory_space<vmem>>, vector<32x8xbf16>
    %23 = arith.truncf %5 : vector<8x256xf32> to vector<8x256xbf16>
    %cst = arith.constant dense<0.000000e+00> : vector<32x256xf32>
    %24 = tpu.matmul %22, %23, %cst {dimension_numbers = #tpu.dot_dimension_numbers<[1], [0], [0], [1], [0, 0, 1, 1], [], []>} : vector<32x8xbf16>, vector<8x256xbf16>, vector<32x256xf32> -> vector<32x256xf32>
    %c0_21 = arith.constant 0 : index
    %c0_22 = arith.constant 0 : index
    %25 = vector.load %arg11[%c0_21, %c0_22] : memref<32x6xbf16, #tpu.memory_space<vmem>>, vector<32x6xbf16>
    %26 = arith.truncf %21 : vector<6x256xf32> to vector<6x256xbf16>
    %cst_23 = arith.constant dense<0.000000e+00> : vector<32x256xf32>
    %27 = tpu.matmul %25, %26, %cst_23 {dimension_numbers = #tpu.dot_dimension_numbers<[1], [0], [0], [1], [0, 0, 1, 1], [], []>} : vector<32x6xbf16>, vector<6x256xbf16>, vector<32x256xf32> -> vector<32x256xf32>
    %28 = arith.addf %24, %27 : vector<32x256xf32>
    %c0_24 = arith.constant 0 : index
    %c0_25 = arith.constant 0 : index
    %29 = vector.load %arg12[%c0_24, %c0_25] : memref<32x2xbf16, #tpu.memory_space<vmem>>, vector<32x2xbf16>
    %30 = arith.truncf %13 : vector<2x256xf32> to vector<2x256xbf16>
    %cst_26 = arith.constant dense<0.000000e+00> : vector<32x256xf32>
    %31 = tpu.matmul %29, %30, %cst_26 {dimension_numbers = #tpu.dot_dimension_numbers<[1], [0], [0], [1], [0, 0, 1, 1], [], []>} : vector<32x2xbf16>, vector<2x256xbf16>, vector<32x256xf32> -> vector<32x256xf32>
    %32 = arith.addf %28, %31 : vector<32x256xf32>
    %c0_27 = arith.constant 0 : index
    %c0_28 = arith.constant 0 : index
    %33 = vector.load %arg13[%c0_27, %c0_28] : memref<32x1xf32, #tpu.memory_space<vmem>>, vector<32x1xf32>
    %34 = vector.broadcast %33 : vector<32x1xf32> to vector<32x256xf32>
    %35 = arith.addf %32, %34 : vector<32x256xf32>
    %c0_29 = arith.constant 0 : index
    %c0_30 = arith.constant 0 : index
    %c0_31 = arith.constant 0 : index
    %36 = vector.load %arg14[%c0_29, %c0_30, %c0_31] : memref<1x32x1xf32, #tpu.memory_space<vmem>>, vector<1x32x1xf32>
    %37 = vector.shape_cast %36 : vector<1x32x1xf32> to vector<32x1xf32>
    %cst_32 = arith.constant 1.000000e+00 : f32
    %38 = vector.broadcast %cst_32 : f32 to vector<32x1xf32>
    %39 = arith.addf %38, %37 : vector<32x1xf32>
    %40 = vector.broadcast %39 : vector<32x1xf32> to vector<32x256xf32>
    %41 = arith.mulf %35, %40 : vector<32x256xf32>
    %c0_33 = arith.constant 0 : index
    %c0_34 = arith.constant 0 : index
    %c0_35 = arith.constant 0 : index
    %42 = vector.load %arg15[%c0_33, %c0_34, %c0_35] : memref<1x32x1xf32, #tpu.memory_space<vmem>>, vector<1x32x1xf32>
    %43 = vector.shape_cast %42 : vector<1x32x1xf32> to vector<32x1xf32>
    %44 = vector.broadcast %43 : vector<32x1xf32> to vector<32x256xf32>
    %45 = arith.addf %41, %44 : vector<32x256xf32>
    %46 = arith.mulf %45, %45 : vector<32x256xf32>
    %47 = arith.mulf %45, %46 : vector<32x256xf32>
    %cst_36 = arith.constant 4.471500e-02 : f32
    %48 = vector.broadcast %cst_36 : f32 to vector<32x256xf32>
    %49 = arith.mulf %48, %47 : vector<32x256xf32>
    %50 = arith.addf %45, %49 : vector<32x256xf32>
    %cst_37 = arith.constant 0.797884583 : f32
    %51 = vector.broadcast %cst_37 : f32 to vector<32x256xf32>
    %52 = arith.mulf %51, %50 : vector<32x256xf32>
    %53 = math.tanh %52 : vector<32x256xf32>
    %cst_38 = arith.constant 1.000000e+00 : f32
    %54 = vector.broadcast %cst_38 : f32 to vector<32x256xf32>
    %55 = arith.addf %54, %53 : vector<32x256xf32>
    %cst_39 = arith.constant 5.000000e-01 : f32
    %56 = vector.broadcast %cst_39 : f32 to vector<32x256xf32>
    %57 = arith.mulf %56, %55 : vector<32x256xf32>
    %58 = arith.mulf %45, %57 : vector<32x256xf32>
    %c0_40 = arith.constant 0 : index
    %c0_41 = arith.constant 0 : index
    %59 = vector.load %arg16[%c0_40, %c0_41] : memref<6x32xbf16, #tpu.memory_space<vmem>>, vector<6x32xbf16>
    %60 = arith.truncf %58 : vector<32x256xf32> to vector<32x256xbf16>
    %cst_42 = arith.constant dense<0.000000e+00> : vector<6x256xf32>
    %61 = tpu.matmul %59, %60, %cst_42 {dimension_numbers = #tpu.dot_dimension_numbers<[1], [0], [0], [1], [0, 0, 1, 1], [], []>} : vector<6x32xbf16>, vector<32x256xbf16>, vector<6x256xf32> -> vector<6x256xf32>
    %c0_43 = arith.constant 0 : index
    %c0_44 = arith.constant 0 : index
    %62 = vector.load %arg17[%c0_43, %c0_44] : memref<6x1xf32, #tpu.memory_space<vmem>>, vector<6x1xf32>
    %63 = vector.broadcast %62 : vector<6x1xf32> to vector<6x256xf32>
    %64 = arith.addf %61, %63 : vector<6x256xf32>
    %c0_45 = arith.constant 0 : index
    %c0_46 = arith.constant 0 : index
    %c0_47 = arith.constant 0 : index
    %c0_48 = arith.constant 0 : index
    %65 = vector.load %arg18[%c0_45, %c0_46, %c0_47, %c0_48] : memref<1x1x6x256xf32, #tpu.memory_space<vmem>>, vector<1x1x6x256xf32>
    %66 = vector.shape_cast %65 : vector<1x1x6x256xf32> to vector<6x256xf32>
    %67 = vector.shape_cast %64 : vector<6x256xf32> to vector<1x1x6x256xf32>
    tpu.vector_store %arg18[%c0_45, %c0_46, %c0_47, %c0_48], %67 {strides = array<i32>} : memref<1x1x6x256xf32, #tpu.memory_space<vmem>>, vector<1x1x6x256xf32>,
    return
  }
  func.func @transform_0(%arg0: i32, %arg1: i32, %arg2: i32) -> i32 {
    %c0_i32 = arith.constant 0 : i32
    %c0_i32_0 = arith.constant 0 : i32
    return %c0_i32 : i32
  }
  func.func @transform_1(%arg0: i32, %arg1: i32, %arg2: i32) -> i32 {
    %c0_i32 = arith.constant 0 : i32
    %c0_i32_0 = arith.constant 0 : i32
    return %c0_i32 : i32
  }
  func.func @transform_2(%arg0: i32, %arg1: i32, %arg2: i32) -> (i32, i32, i32, i32) {
    %c0_i32 = arith.constant 0 : i32
    %c0_i32_0 = arith.constant 0 : i32
    return %arg0, %arg1, %c0_i32, %arg2 : i32, i32, i32, i32
  }
  func.func @transform_3(%arg0: i32, %arg1: i32, %arg2: i32) -> (i32, i32, i32, i32) {
    %c0_i32 = arith.constant 0 : i32
    %c0_i32_0 = arith.constant 0 : i32
    return %arg0, %arg1, %c0_i32, %arg2 : i32, i32, i32, i32
  }
  func.func @transform_4(%arg0: i32, %arg1: i32, %arg2: i32) -> (i32, i32, i32, i32) {
    %c0_i32 = arith.constant 0 : i32
    %c0_i32_0 = arith.constant 0 : i32
    return %arg0, %arg1, %c0_i32, %arg2 : i32, i32, i32, i32
  }
  func.func @transform_5(%arg0: i32, %arg1: i32, %arg2: i32) -> (i32, i32, i32, i32) {
    %c0_i32 = arith.constant 0 : i32
    %c0_i32_0 = arith.constant 0 : i32
    return %arg0, %arg1, %c0_i32, %arg2 : i32, i32, i32, i32
  }
  func.func @transform_6(%arg0: i32, %arg1: i32, %arg2: i32) -> (i32, i32, i32, i32) {
    %c0_i32 = arith.constant 0 : i32
    %c0_i32_0 = arith.constant 0 : i32
    return %arg0, %arg1, %c0_i32, %arg2 : i32, i32, i32, i32
  }
  func.func @transform_7(%arg0: i32, %arg1: i32, %arg2: i32) -> (i32, i32) {
    %c0_i32 = arith.constant 0 : i32
    %c0_i32_0 = arith.constant 0 : i32
    %c0_i32_1 = arith.constant 0 : i32
    return %c0_i32, %c0_i32_0 : i32, i32
  }
  func.func @transform_8(%arg0: i32, %arg1: i32, %arg2: i32) -> (i32, i32) {
    %c0_i32 = arith.constant 0 : i32
    %c0_i32_0 = arith.constant 0 : i32
    %c0_i32_1 = arith.constant 0 : i32
    return %c0_i32, %c0_i32_0 : i32, i32
  }
  func.func @transform_9(%arg0: i32, %arg1: i32, %arg2: i32) -> (i32, i32) {
    %c0_i32 = arith.constant 0 : i32
    %c0_i32_0 = arith.constant 0 : i32
    %c0_i32_1 = arith.constant 0 : i32
    return %c0_i32, %c0_i32_0 : i32, i32
  }
  func.func @transform_10(%arg0: i32, %arg1: i32, %arg2: i32) -> (i32, i32) {
    %c0_i32 = arith.constant 0 : i32
    %c0_i32_0 = arith.constant 0 : i32
    %c0_i32_1 = arith.constant 0 : i32
    return %c0_i32, %c0_i32_0 : i32, i32
  }
  func.func @transform_11(%arg0: i32, %arg1: i32, %arg2: i32) -> (i32, i32, i32) {
    %c0_i32 = arith.constant 0 : i32
    %c0_i32_0 = arith.constant 0 : i32
    %c0_i32_1 = arith.constant 0 : i32
    return %arg0, %c0_i32, %c0_i32_0 : i32, i32, i32
  }
  func.func @transform_12(%arg0: i32, %arg1: i32, %arg2: i32) -> (i32, i32, i32) {
    %c0_i32 = arith.constant 0 : i32
    %c0_i32_0 = arith.constant 0 : i32
    %c0_i32_1 = arith.constant 0 : i32
    return %arg0, %c0_i32, %c0_i32_0 : i32, i32, i32
  }
  func.func @transform_13(%arg0: i32, %arg1: i32, %arg2: i32) -> (i32, i32) {
    %c0_i32 = arith.constant 0 : i32
    %c0_i32_0 = arith.constant 0 : i32
    %c0_i32_1 = arith.constant 0 : i32
    return %c0_i32, %c0_i32_0 : i32, i32
  }
  func.func @transform_14(%arg0: i32, %arg1: i32, %arg2: i32) -> (i32, i32) {
    %c0_i32 = arith.constant 0 : i32
    %c0_i32_0 = arith.constant 0 : i32
    %c0_i32_1 = arith.constant 0 : i32
    return %c0_i32, %c0_i32_0 : i32, i32
  }
  func.func @transform_15(%arg0: i32, %arg1: i32, %arg2: i32) -> (i32, i32, i32, i32) {
    %c0_i32 = arith.constant 0 : i32
    %c0_i32_0 = arith.constant 0 : i32
    return %arg0, %arg1, %c0_i32, %arg2 : i32, i32, i32, i32
  }
}

</mosaic_0001>

<bundles_post_ra>
// kernel: ray_diffuser_forward.1
= control target key start
LH: loop header
LB: loop body
LE: loop exit
PB: predicated region body
PF: predicated region fallthrough
CT: control target
= control target key end

     0   :  { %s2134_s0 = inlined_call_operand.vmem [shape: f32[2], index: 0, kind: input, shape index: {}]   ;;  %s2135_s1 = inlined_call_operand.vmem [shape: f32[2], index: 1, kind: input, shape index: {}]   ;;  %s2136_s2 = inlined_call_operand.vmem [shape: f32[2,1,8,256], index: 2, kind: input, shape index: {}]   ;;  %s2137_s3 = inlined_call_operand.vmem [shape: f32[2,1,6,256], index: 3, kind: input, shape index: {}]   ;;  %s2138_s4 = inlined_call_operand.vmem [shape: f32[2,1,6,256], index: 4, kind: input, shape index: {}]   ;;  %s2139_s5 = inlined_call_operand.vmem [shape: f32[2,1,6,256], index: 5, kind: input, shape index: {}]   ;;  %s2140_s6 = inlined_call_operand.vmem [shape: f32[2,1,2,256], index: 6, kind: input, shape index: {}]   ;;  %s2141_s7 = inlined_call_operand.vmem [shape: bf16[32,8], index: 7, kind: input, shape index: {}]   ;;  %s2142_s8 = inlined_call_operand.vmem [shape: bf16[32,6], index: 8, kind: input, shape index: {}]   ;;  %s2143_s9 = inlined_call_operand.vmem [shape: bf16[32,2], index: 9, kind: input, shape index: {}]   ;;  %s2144_s10 = inlined_call_operand.vmem [shape: f32[32,1], index: 10, kind: input, shape index: {}]   ;;  %s2145_s11 = inlined_call_operand.vmem [shape: f32[2,32,1], index: 11, kind: input, shape index: {}]   ;;  %s2146_s12 = inlined_call_operand.vmem [shape: f32[2,32,1], index: 12, kind: input, shape index: {}]   ;;  %s2147_s13 = inlined_call_operand.vmem [shape: bf16[6,32], index: 13, kind: input, shape index: {}]   ;;  %s2148_s14 = inlined_call_operand.vmem [shape: f32[6,1], index: 14, kind: input, shape index: {}]   ;;  %s2149_s15 = inlined_call_operand.vmem [shape: f32[2,1,6,256], index: 15, kind: output, shape index: {}]  }
   0x1   :  { %2155 = sst [smem:[#allocation11_spill]] %s2134_s0 }
   0x2   :  { %2156 = sst [smem:[#allocation12_spill]] %s2135_s1 }
   0x3   :  { %20 = vsyncpa [#allocation3], 0 }
   0x4   :  { %21 = vsyncpa [#allocation5], 0  ;;  %s1893_s18 = smov 0   ;;  %s1895_s19 = smov 0  }
   0x5   :  { %s1897_s20 = smov 0  }
   0x6 LB: > { %2157 = sst [smem:[#allocation8_spill]] %s1804_s19  ;;  %s1610_s21 = sadd.s32 4294967295, %s1808_s20   ;;  %s1808_s20 = sphi %s1897_s20, %s27_s20   ;;  %s1804_s19 = sphi %s1895_s19, %s2169_s19   ;;  %s1800_s18 = sphi %s1893_s18, %s2168_s18  }
   0x7   : > { %2158 = sst [smem:[#allocation9_spill]] %s1808_s20  ;;  %s46_s22 = sadd.s32 1, %s1804_s19 }
   0x8   : > { %p48_p0 = scmp.ge.s32.totalorder %s46_s22, 2  ;;  %p1612_p1 = scmp.ge.s32.totalorder %s1808_s20, 1 }
   0x9   : > { %p451_p2 = scmp.lt.s32.totalorder %s1808_s20, 3  ;;  %p1918_p4 = scmp.eq.s32.totalorder %s1610_s21, 0 }
   0xa   : > { %s2171_s22 = smov (%p48_p0, %s46_s22), 0  ;;  %s2162_s0 = sld [smem:[#allocation11_spill]] }
   0xb   : > { %2159 = sst [smem:[#allocation10_spill]] %s2171_s22  ;;  %p1914_p3 = pnand %p1612_p1, %p451_p2 }
   0xc   : > { %s2161_s24 = scalar_select %p1918_p4, 1, 0 }
   0xd   : > { %s2160_s23 = scalar_select %p1914_p3, 1, 0 }
   0xe   : > { %p1686_p5 = pneg %p1914_p3  ;;  %s2163_s1 = sld [smem:[#allocation12_spill]] }
  0x10   : > { %s464_s27 = sshll.u32 %s2162_s0, 4  ;;  %p1932_p6 = pnand %p1918_p4, %p1686_p5  ;;  %s465_s27 = int_to_ptr.vmem [resolvable:$true] %s464_s27 }
  0x11   : > { %s1748_s17 = scalar_lea.vmem %s465_s27, 16  ;;  %p1756_p11 = scmp.lt.s32.totalorder %s465_s27, %s465_s27 }
  0x12   : > { %p1749_p7 = scmp.ne.s32.totalorder %s465_s27, %s1748_s17  ;;  %p1750_p8 = pneg %p1932_p6 }
  0x13   : > { %p1757_p12 = scmp.lt.s32.totalorder %s1748_s17, %s1748_s17 }
  0x14   : > { %s475_s30 = sshll.u32 %s2163_s1, 4  ;;  %p1751_p9 = pnand %p1750_p8, %p1749_p7  ;;  %s476_s30 = int_to_ptr.vmem [resolvable:$true] %s475_s30 }
  0x15   : > { %p1758_p13 = por %p1757_p12, %p1756_p11 }
  0x16   : > { %p1752_p10 = pneg %p1751_p9 }
  0x18   : > { %p1759_p0 = pnand %p1758_p13, %p1752_p10 }
  0x1a   : > { %1762 = shalt.err (!%p1759_p0)
}
  0x1b   : > { %s1810_s21 = smov [#allocation2]   ;;  %s1763_s25 = scalar_lea.vmem %s476_s30, 16 }
  0x1c   : > { %1689 = dma.vmem_to_smem (!%p1932_p6), %s465_s27, 16, %s1810_s21, [#allocation3]  }
  0x1d   : > { %p1764_p1 = scmp.ne.s32.totalorder %s476_s30, %s1763_s25  ;;  %p1771_p4 = scmp.lt.s32.totalorder %s476_s30, %s476_s30 }
  0x1e   : > { %p1772_p3 = scmp.lt.s32.totalorder %s1763_s25, %s1763_s25 }
  0x1f   : > { %p1766_p2 = pnand %p1764_p1, %p1750_p8 }
  0x20   : > { %p1773_p7 = por %p1772_p3, %p1771_p4 }
  0x21   : > { %p1767_p5 = pneg %p1766_p2 }
  0x23   : > { %p1774_p9 = pnand %p1773_p7, %p1767_p5 }
  0x25   : > { %1777 = shalt.err (!%p1774_p9)
}
  0x26   : > { %s1811_s26 = smov [#allocation4]   ;;  %p2165_p10 = scmp.ne.s32.totalorder %s2160_s23, 0 }
  0x27   : > { %1692 = dma.vmem_to_smem (!%p1932_p6), %s476_s30, 16, %s1811_s26, [#allocation5]  }
  0x28   : > { %607 = sbr.rel (%p2165_p10) target bundleno = 561 (0x231), region = 80  ;;  %p2166_p11 = scmp.ne.s32.totalorder (!%p2165_p10), %s2161_s24, 0 }
  0x2f   : > { %1791 = dma.done.wait (%p2166_p11), [#allocation3], 16  }
  0x30   : > { %1793 = vsyncadd (%p2166_p11), [#allocation3], 4294967280 }
  0x31   : > { %1795 = dma.done.wait (%p2166_p11), [#allocation5], 16  }
  0x32   : > { %1797 = vsyncadd (%p2166_p11), [#allocation5], 4294967280 }
  0x33   : > { %617 = sfence }
  0x34   : > { %p739_p3 = scmp.lt.s32.totalorder %s1800_s18, 1  ;;  %v1812_v0 = vmov 0   ;;  %s1961_s24 = sld [smem:[#allocation2 + %s1800_s18]]  ;;  %vm964_vm0 = vcmask 1043456   ;;  %vm1058_vm1 = vcmask 1040384   ;;  %v1726_v13 = vld [vmem:[%s2141_s7] sm:$0xff]  }
  0x35   : > { %1003 = vmatprep.mubr.bf16.mxu0 %v1812_v0  ;;  %926 = vmatprep.mubr.bf16.mxu1 %v1812_v0  ;;  %s1964_s27 = sld [smem:[#allocation4 + %s1800_s18]]  ;;  %vm957_vm2 = vcmask 64512   ;;  %v1126_v19 = vld [vmem:[%s2144_s10] sm:$0xff]  ;;  %v1129_v23 = vld [vmem:[%s2144_s10 + $0x18] sm:$0xff]  ;;  %v1127_v24 = vld [vmem:[%s2144_s10 + $0x8] sm:$0xff]  ;;  %vm887_vm3 = vcmask 1042432  }
  0x36   : > { %s1956_s23 = scalar_select %p739_p3, %s1800_s18, 1  ;;  %1724 = vset.pattern.permute.xlu0 %v1812_v0  ;;  %1725 = vset.pattern.permute.xlu1 %v1812_v0  ;;  %v1128_v34 = vld [vmem:[%s2144_s10 + $0x10] sm:$0xff]  ;;  %v1727_v36 = vld [vmem:[%s2141_s7 + $0x8] sm:$0xff]   ;;  %v1728_v48 = vld [vmem:[%s2142_s8] sm:$0xff]   ;;  %vm880_vm4 = vcmask 48128   ;;  %vm1051_vm5 = vcmask 15360  }
  0x37   : > { %1132 = vperm.xlu0 %1724, %v1126_v19   ;;  %1147 = vperm.xlu1 %1725, %v1129_v23   ;;  %v1729_v51 = vld [vmem:[%s2143_s9] sm:$0xff]   ;;  %v1730_v54 = vld [vmem:[%s2142_s8 + $0x8] sm:$0xff]   ;;  %vm1309_vm6 = vcmask 261120  }
  0x38   : > { %s1967_s28 = sshll.u32 %s1956_s23, 4  ;;  %s1658_s29 = sshll.u32 %s1956_s23, 2  ;;  %v1303_v55 = vld [vmem:[%s2148_s14] sm:$0x3f]  ;;  %v1731_v56 = vld [vmem:[%s2143_s9 + $0x8] sm:$0xff]  }
  0x39   : > { %s750_s17 = scalar_lea.vmem %s2136_s2, %s1967_s28  ;;  %s806_s26 = scalar_lea.vmem %s2140_s6, %s1658_s29 }
  0x3a   : > { %v836_v1 = vld [vmem:[%s750_s17 + $0x8] sm:$0xff]  ;;  %v835_v2 = vld [vmem:[%s750_s17] sm:$0xff]  ;;  %s764_s1 = scalar_lea.vmem %s2137_s3, %s1967_s28  ;;  %s778_s20 = scalar_lea.vmem %s2138_s4, %s1967_s28  ;;  %v844_v15 = vstv %s1961_s24 }
  0x3b   : > { %v1645_v3 = vld.sshfl [vmem:[%s806_s26] sm:$0x33 pattern:$0x76325410]  ;;  %v863_v4 = vpack.c.bf16 %v836_v1, %v836_v1  ;;  %v862_v5 = vpack.c.bf16 %v835_v2, %v835_v2  ;;  %v838_v8 = vld [vmem:[%s764_s1 + $0x8] sm:$0x3f]  ;;  %v847_v17 = vstv %s1964_s27  ;;  %s792_s16 = scalar_lea.vmem %s2139_s5, %s1967_s28  ;;  %1137 = vperm.xlu0 %1724, %v1127_v24   ;;  %s830_s30 = scalar_lea.vmem %s2149_s15, %s1967_s28 }
  0x3c   : > { %v1036_v6 = vcombine.high %v1645_v3, %v1645_v3  ;;  %v1039_v7 = vpack.c.bf16 %v1645_v3, %v1645_v3  ;;  %v837_v9 = vld [vmem:[%s764_s1] sm:$0x3f]  ;;  %v840_v10 = vld [vmem:[%s778_s20 + $0x8] sm:$0x3f]  ;;  %v846_v16 = vmul.f32 %v844_v15, %v838_v8 }
  0x3d   : > { %v839_v11 = vld [vmem:[%s778_s20] sm:$0x3f]  ;;  %1642 = vmatprep.subr.msk.bf16.mxu0 %vm964_vm0, %v863_v4  ;;  %v966_v12 = vsel %vm964_vm0, %v862_v5, 0  ;;  %v845_v18 = vmul.f32 %v844_v15, %v837_v9  ;;  %s1659_s20 = sshll.u32 %s1956_s23, 5  ;;  %v849_v21 = vmul.f32 %v847_v17, %v840_v10  ;;  %v842_v30 = vld [vmem:[%s792_s16 + $0x8] sm:$0x3f] }
  0x3e   : > { %v1040_v14 = vpack.c.bf16 %v1036_v6, %v1036_v6  ;;  %972 = vmatpush1.bf16.msra.mxu0 %v966_v12  ;;  %v1060_v20 = vsel %vm1058_vm1, %v1039_v7, 0  ;;  %v848_v22 = vmul.f32 %v847_v17, %v839_v11  ;;  %s2010_s25 = scalar_lea.vmem %s2145_s11, %s1659_s20  ;;  %v841_v31 = vld [vmem:[%s792_s16] sm:$0x3f]  ;;  %s2030_s16 = scalar_lea.vmem %s2146_s12, %s1659_s20 }
  0x3f   : > { %v1158_v25 = vld [vmem:[%s2010_s25] sm:$0xff]  ;;  %v851_v26 = vadd.f32 %v849_v21, %v846_v16  ;;  %v1159_v29 = vld [vmem:[%s2010_s25 + $0x8] sm:$0xff]  ;;  %1142 = vperm.xlu0 %1724, %v1128_v34   ;;  %v1160_v42 = vld [vmem:[%s2010_s25 + $0x10] sm:$0xff] }
  0x40   : > { %1648 = vmatprep.subr.msk.bf16.mxu0 %vm1058_vm1, %v1040_v14  ;;  %v850_v27 = vadd.f32 %v848_v22, %v845_v18  ;;  %v1162_v28 = vadd.f32 1.0, %v1158_v25  ;;  %v1163_v35 = vadd.f32 1.0, %v1159_v29  ;;  %v1194_v41 = vld [vmem:[%s2030_s16] sm:$0xff]  ;;  %v1195_v45 = vld [vmem:[%s2030_s16 + $0x8] sm:$0xff]  ;;  %v1161_v46 = vld [vmem:[%s2010_s25 + $0x18] sm:$0xff]  ;;  %v1164_v49 = vadd.f32 1.0, %v1160_v42 }
  0x41   : > { %1643 = vmatmul.mubr.msk.bf16.vlgmr.msra.gmra.mrb[0].mxu0 %vm957_vm2, %v1726_v13  ;;  %v853_v32 = vsub.f32 %v851_v26, %v838_v8  ;;  %v1165_v50 = vadd.f32 1.0, %v1161_v46  ;;  %v1196_v52 = vld [vmem:[%s2030_s16 + $0x10] sm:$0xff]  ;;  %v1197_v53 = vld [vmem:[%s2030_s16 + $0x18] sm:$0xff] }
  0x42   : > { %1066 = vmatpush1.bf16.msra.mxu0 %v1060_v20  ;;  %1013 = vmatprep.mubr.bf16.mxu0 %v1812_v0  ;;  %v852_v33 = vsub.f32 %v850_v27, %v837_v9 }
  0x43   : > { %1168 = vperm.xlu1 %1725, %v1162_v28   ;;  %v855_v37 = vmul.f32 %v853_v32, %v842_v30  ;;  %1200 = vperm.xlu0 %1724, %v1194_v41  }
  0x44   : > { %v854_v38 = vmul.f32 %v852_v33, %v841_v31 }
  0x45   : > { %v857_v39 = vadd.f32 %v855_v37, %v838_v8 }
  0x46   : > { %v856_v40 = vadd.f32 %v854_v38, %v837_v9 }
  0x47   : > { %1173 = vperm.xlu1 %1725, %v1163_v35   ;;  %v869_v43 = vpack.c.bf16 %v857_v39, %v857_v39  ;;  %1178 = vperm.xlu0 %1724, %v1164_v49  }
  0x48   : > { %v868_v44 = vpack.c.bf16 %v856_v40, %v856_v40 }
  0x49   : > { %1644 = vmatmul.mubr.msk.bf16.gmra.mrb[4].mxu0 %vm957_vm2, %v1727_v36  ;;  %1637 = vmatprep.subr.msk.bf16.mxu1 %vm887_vm3, %v869_v43 }
  0x4a   : > { %1097 = vmatprep.mubr.bf16.mxu0 %v1812_v0  ;;  %v889_v47 = vsel %vm887_vm3, %v868_v44, 0 }
  0x4b   : > { %895 = vmatpush1.bf16.msra.mxu1 %v889_v47  ;;  %1205 = vperm.xlu1 %1725, %v1195_v45  }
  0x4c   : > { %1210 = vperm.xlu0 %1724, %v1196_v52  }
  0x4e   : > { %1638 = vmatmul.mubr.msk.bf16.vlgmr.msra.gmra.mrb[0].mxu1 %vm880_vm4, %v1728_v48 }
  0x4f   : > { %936 = vmatprep.mubr.bf16.mxu1 %v1812_v0  ;;  %1183 = vperm.xlu1 %1725, %v1165_v50  }
  0x50   : > { %1306 = vperm.xlu0 %1724, %v1303_v55  }
  0x51   : > { %1649 = vmatmul.mubr.msk.bf16.vlgmr.msra.gmra.mrb[0].mxu0 %vm1051_vm5, %v1729_v51 }
  0x52   : > { %1107 = vmatprep.mubr.bf16.mxu0 %v1812_v0 }
  0x53   : > { %1215 = vperm.xlu1 %1725, %v1197_v53  }
  0x56   : > { %1639 = vmatmul.mubr.msk.bf16.gmra.mrb[4].mxu1 %vm880_vm4, %v1730_v54 }
  0x57   : > { %1345 = vmatprep.mubr.bf16.mxu1 %v1812_v0 }
  0x59   : > { %1650 = vmatmul.mubr.msk.bf16.gmra.mrb[4].mxu0 %vm1051_vm5, %v1731_v56 }
  0xb6   : > { %v1133_v57 = vpop.permute.xlu0 %1132  ;;  %v1148_v58 = vpop.permute.xlu1 %1147 }
  0xba   : > { %v1138_v59 = vpop.permute.xlu0 %1137 }
  0xbe   : > { %v1143_v61 = vpop.permute.xlu0 %1142 }
  0xc2   : > { %v1169_v60 = vpop.permute.xlu1 %1168  ;;  %v1201_v1 = vpop.permute.xlu0 %1200 }
  0xc6   : > { %v1174_v62 = vpop.permute.xlu1 %1173  ;;  %v1179_v20 = vpop.permute.xlu0 %1178 }
  0xca   : > { %v1206_v12 = vpop.permute.xlu1 %1205 }
  0xcb   : > { %v1211_v51 = vpop.permute.xlu0 %1210 }
  0xce   : > { %v1184_v33 = vpop.permute.xlu1 %1183 }
 0x121   : > { %v928_v63 = vpop.f32.mrb[0].mxu1 }
 0x122   : > { %v930_v2 = vpop.f32.mrb[1].mxu1 }
 0x123   : > { %v932_v3 = vpop.f32.mrb[2].mxu1 }
 0x124   : > { %v1099_v4 = vpop.f32.mrb[0].mxu0  ;;  %v934_v5 = vpop.f32.mrb[3].mxu1 }
 0x125   : > { %v1662_v6 = vadd.f32 %v1099_v4, %v928_v63  ;;  %v1101_v7 = vpop.f32.mrb[1].mxu0 }
 0x126   : > { %v1663_v8 = vadd.f32 %v1101_v7, %v930_v2  ;;  %v1103_v9 = vpop.f32.mrb[2].mxu0 }
 0x127   : > { %v1150_v10 = vadd.f32 %v1662_v6, %v1133_v57  ;;  %v1664_v0 = vadd.f32 %v1103_v9, %v932_v3  ;;  %v1105_v11 = vpop.f32.mrb[3].mxu0 }
 0x128   : > { %v1151_v13 = vadd.f32 %v1663_v8, %v1133_v57  ;;  %v1665_v14 = vadd.f32 %v1105_v11, %v934_v5 }
 0x129   : > { %v1186_v15 = vmul.f32 %v1169_v60, %v1150_v10  ;;  %v1152_v16 = vadd.f32 %v1664_v0, %v1138_v59  ;;  %v938_v19 = vpop.f32.mrb[4].mxu1 }
 0x12a   : > { %v1187_v17 = vmul.f32 %v1169_v60, %v1151_v13  ;;  %v1153_v18 = vadd.f32 %v1665_v14, %v1138_v59  ;;  %v940_v23 = vpop.f32.mrb[5].mxu1 }
 0x12b   : > { %v2062_v21 = vadd.f32 %v1201_v1, %v1186_v15  ;;  %v1188_v22 = vmul.f32 %v1174_v62, %v1152_v16  ;;  %v942_v26 = vpop.f32.mrb[6].mxu1 }
 0x12c   : > { %v2064_v24 = vadd.f32 %v1201_v1, %v1187_v17  ;;  %v1189_v25 = vmul.f32 %v1174_v62, %v1153_v18  ;;  %v1109_v27 = vpop.f32.mrb[4].mxu0  ;;  %v944_v30 = vpop.f32.mrb[7].mxu1 }
 0x12d   : > { %v1226_v28 = vmul.f32 %v2062_v21, %v2062_v21  ;;  %v2068_v29 = vadd.f32 %v1206_v12, %v1188_v22  ;;  %v1666_v31 = vadd.f32 %v1109_v27, %v938_v19  ;;  %v1111_v32 = vpop.f32.mrb[5].mxu0  ;;  %v1216_v62 = vpop.permute.xlu1 %1215 }
 0x12e   : > { %v1227_v34 = vmul.f32 %v2064_v24, %v2064_v24  ;;  %v2072_v35 = vadd.f32 %v1206_v12, %v1189_v25  ;;  %v1667_v36 = vadd.f32 %v1111_v32, %v940_v23  ;;  %v1113_v37 = vpop.f32.mrb[6].mxu0 }
 0x12f   : > { %v1234_v38 = vmul.f32 %v1226_v28, %v2062_v21  ;;  %v1228_v39 = vmul.f32 %v2068_v29, %v2068_v29  ;;  %v1154_v40 = vadd.f32 %v1666_v31, %v1143_v61  ;;  %v1668_v41 = vadd.f32 %v1113_v37, %v942_v26  ;;  %v1115_v42 = vpop.f32.mrb[7].mxu0 }
 0x130   : > { %v1235_v43 = vmul.f32 %v1227_v34, %v2064_v24  ;;  %v1229_v44 = vmul.f32 %v2072_v35, %v2072_v35  ;;  %v1155_v45 = vadd.f32 %v1667_v36, %v1143_v61  ;;  %v1669_v46 = vadd.f32 %v1115_v42, %v944_v30 }
 0x131   : > { %v1242_v47 = vmul.f32 0.044715, %v1234_v38  ;;  %v1236_v48 = vmul.f32 %v1228_v39, %v2068_v29  ;;  %v1190_v49 = vmul.f32 %v1179_v20, %v1154_v40  ;;  %v1156_v50 = vadd.f32 %v1668_v41, %v1148_v58 }
 0x132   : > { %v1237_v52 = vmul.f32 %v1229_v44, %v2072_v35  ;;  %v1191_v53 = vmul.f32 %v1179_v20, %v1155_v45  ;;  %v1157_v54 = vadd.f32 %v1669_v46, %v1148_v58  ;;  %v1243_v55 = vmul.f32 0.044715, %v1235_v43 }
 0x133   : > { %v1250_v56 = vadd.f32 %v1242_v47, %v2062_v21  ;;  %v1244_v57 = vmul.f32 0.044715, %v1236_v48  ;;  %v2083_v59 = vadd.f32 %v1211_v51, %v1190_v49  ;;  %v1192_v60 = vmul.f32 %v1184_v33, %v1156_v50 }
 0x134   : > { %v2085_v61 = vadd.f32 %v1211_v51, %v1191_v53  ;;  %v1193_v63 = vmul.f32 %v1184_v33, %v1157_v54  ;;  %v1245_v1 = vmul.f32 0.044715, %v1237_v52  ;;  %v1251_v2 = vadd.f32 %v1243_v55, %v2064_v24 }
 0x135   : > { %v1258_v3 = vmul.f32 0.7978846, %v1250_v56  ;;  %v1252_v4 = vadd.f32 %v1244_v57, %v2068_v29  ;;  %v1230_v58 = vmul.f32 %v2083_v59, %v2083_v59  ;;  %v2091_v5 = vadd.f32 %v1216_v62, %v1192_v60 }
 0x136   : > { %v1231_v6 = vmul.f32 %v2085_v61, %v2085_v61  ;;  %v2095_v7 = vadd.f32 %v1216_v62, %v1193_v63  ;;  %v1253_v8 = vadd.f32 %v1245_v1, %v2072_v35  ;;  %v1259_v9 = vmul.f32 0.7978846, %v1251_v2 }
 0x137   : > { %v1260_v10 = vmul.f32 0.7978846, %v1252_v4  ;;  %v1238_v0 = vmul.f32 %v1230_v58, %v2083_v59  ;;  %v1232_v11 = vmul.f32 %v2091_v5, %v2091_v5  ;;  %1732 = vtanh.f32 %v1258_v3  ;;  %v1298_v58 = vld [vmem:[%s2147_s13] sm:$0x7] }
 0x138   : > { %v1239_v12 = vmul.f32 %v1231_v6, %v2085_v61  ;;  %v1233_v13 = vmul.f32 %v2095_v7, %v2095_v7  ;;  %v1261_v14 = vmul.f32 0.7978846, %v1253_v8  ;;  %1734 = vtanh.f32 %v1259_v9  ;;  %v1307_v6 = vpop.permute.xlu0 %1306 }
 0x139   : > { %v1246_v15 = vmul.f32 0.044715, %v1238_v0  ;;  %v1240_v16 = vmul.f32 %v1232_v11, %v2091_v5  ;;  %1736 = vtanh.f32 %v1260_v10 }
 0x13a   : > { %v1241_v17 = vmul.f32 %v1233_v13, %v2095_v7  ;;  %1738 = vtanh.f32 %v1261_v14  ;;  %v1247_v18 = vmul.f32 0.044715, %v1239_v12 }
 0x13b   : > { %v1254_v19 = vadd.f32 %v1246_v15, %v2083_v59  ;;  %v1248_v20 = vmul.f32 0.044715, %v1240_v16 }
 0x13c   : > { %v1249_v22 = vmul.f32 0.044715, %v1241_v17  ;;  %v1255_v23 = vadd.f32 %v1247_v18, %v2085_v61 }
 0x13d   : > { %v1262_v25 = vmul.f32 0.7978846, %v1254_v19  ;;  %v1256_v26 = vadd.f32 %v1248_v20, %v2091_v5 }
 0x13e   : > { %v1257_v27 = vadd.f32 %v1249_v22, %v2095_v7  ;;  %v1263_v28 = vmul.f32 0.7978846, %v1255_v23 }
 0x13f   : > { %v1264_v30 = vmul.f32 0.7978846, %v1256_v26  ;;  %1740 = vtanh.f32 %v1262_v25 }
 0x140   : > { %v1265_v31 = vmul.f32 0.7978846, %v1257_v27  ;;  %1742 = vtanh.f32 %v1263_v28 }
 0x141   : > { %v1733_v32 = vpop.eup %1732  ;;  %1744 = vtanh.f32 %v1264_v30 }
 0x142   : > { %v1735_v33 = vpop.eup %1734  ;;  %v1274_v34 = vadd.f32 1.0, %v1733_v32  ;;  %1746 = vtanh.f32 %v1265_v31 }
 0x143   : > { %v1737_v36 = vpop.eup %1736  ;;  %v1275_v37 = vadd.f32 1.0, %v1735_v33 }
 0x144   : > { %v1739_v38 = vpop.eup %1738  ;;  %v1276_v39 = vadd.f32 1.0, %v1737_v36  ;;  %v1282_v40 = vmul.f32 0.5, %v1274_v34 }
 0x145   : > { %v1277_v41 = vadd.f32 1.0, %v1739_v38  ;;  %v1283_v42 = vmul.f32 0.5, %v1275_v37 }
 0x146   : > { %v1284_v43 = vmul.f32 0.5, %v1276_v39  ;;  %v1290_v45 = vmul.f32 %v1282_v40, %v2062_v21 }
 0x147   : > { %v1285_v44 = vmul.f32 0.5, %v1277_v41  ;;  %v1291_v48 = vmul.f32 %v1283_v42, %v2064_v24 }
 0x148   : > { %v1292_v46 = vmul.f32 %v1284_v43, %v2068_v29 }
 0x149   : > { %v1741_v47 = vpop.eup %1740  ;;  %v1293_v49 = vmul.f32 %v1285_v44, %v2072_v35 }
 0x14a   : > { %v1743_v50 = vpop.eup %1742  ;;  %v1299_v51 = vpack.c.bf16 %v1292_v46, %v1290_v45  ;;  %v1278_v52 = vadd.f32 1.0, %v1741_v47 }
 0x14b   : > { %v1745_v53 = vpop.eup %1744  ;;  %v1300_v54 = vpack.c.bf16 %v1293_v49, %v1291_v48  ;;  %v1279_v55 = vadd.f32 1.0, %v1743_v50 }
 0x14c   : > { %v1747_v56 = vpop.eup %1746  ;;  %v1280_v57 = vadd.f32 1.0, %v1745_v53  ;;  %v1286_v60 = vmul.f32 0.5, %v1278_v52 }
 0x14d   : > { %1313 = vmatprep.subr.bf16.mxu1 %v1300_v54  ;;  %v1281_v62 = vadd.f32 1.0, %v1747_v56  ;;  %v1287_v63 = vmul.f32 0.5, %v1279_v55 }
 0x14e   : > { %1314 = vmatpush1.bf16.msra.mxu1 %v1299_v51  ;;  %v1288_v21 = vmul.f32 0.5, %v1280_v57  ;;  %v1294_v24 = vmul.f32 %v1286_v60, %v2083_v59 }
 0x14f   : > { %v1289_v29 = vmul.f32 0.5, %v1281_v62  ;;  %v1295_v1 = vmul.f32 %v1287_v63, %v2085_v61 }
 0x150   : > { %v1296_v35 = vmul.f32 %v1288_v21, %v2091_v5 }
 0x151   : > { %v1297_v2 = vmul.f32 %v1289_v29, %v2095_v7 }
 0x152   : > { %v1301_v3 = vpack.c.bf16 %v1296_v35, %v1294_v24 }
 0x153   : > { %v1302_v4 = vpack.c.bf16 %v1297_v2, %v1295_v1 }
 0x155   : > { %1315 = vmatprep.subr.bf16.mxu1 %v1302_v4 }
 0x156   : > { %1316 = vmatpush1.bf16.msra.mxu1 %v1301_v3 }
 0x159   : > { %1651 = vmatmul.mubr.msk.bf16.vlgmr.msra.gmra.mrb[8].mxu1 %vm1309_vm6, %v1298_v58 }
 0x22c   : > { %v1347_v59 = vpop.f32.mrb[8].mxu1 }
 0x22d   : > { %v1348_v5 = vadd.f32 %v1347_v59, %v1307_v6  ;;  %v1349_v61 = vpop.f32.mrb[9].mxu1 }
 0x22e   : > { %v1350_v8 = vadd.f32 %v1349_v61, %v1307_v6  ;;  %v1351_v7 = vpop.f32.mrb[10].mxu1 }
 0x22f   : > { %1354 = vst [vmem:[%s830_s30] sm:$0x3f] %v1348_v5  ;;  %v1352_v9 = vpop.f32.mrb[11].mxu1 }
 0x230   : > { %1355 = vst [vmem:[%s830_s30 + $0x8] sm:$0x3f] %v1350_v8 }
 0x231 PF: > { %s2167_s16 = sld [smem:[#allocation9_spill]]  ;;  %s2168_s18 = sld [smem:[#allocation8_spill]] }
 0x232   : > { %s2169_s19 = sld [smem:[#allocation10_spill]] }
 0x237   : > { %s27_s20 = sadd.s32 1, %s2167_s16  }
 0x238   : > { %p24_p4 = scmp.ge.s32.totalorder %s27_s20, 4  }
 0x23a   :  { %26 = sbr.rel (!%p24_p4) target bundleno = 6 (0x6), region = 137 }
 0x241   :  { %1394 = vsyncpa [#allocation3], 1 }
 0x242   :  { %1396 = vsyncpa [#allocation3 + $0x1], 1 }
 0x243   :  { %1397 = vsyncpa [#allocation5], 1 }

</bundles_post_ra>
